<compile_context>
chip_gen: v6e
topology: v6e:2x2x1
jax: 0.10.0
libtpu: 0.0.40
codegen_flags: <defaults>
</compile_context>

<pallas_src>
import functools
import numpy as np
import jax
import jax.numpy as jnp
from jax.experimental import pallas as pl
from jax.experimental.pallas import tpu as pltpu

NUM_LAYERS = 2
NHEAD = 2
LN_EPS = 1e-5
LANE = 128


def _round_up(x, m):
    return ((x + m - 1) // m) * m


# ----------------------------------------------------------------------------
# One-time preprocessing (hoisted out of the forward hot path)
# ----------------------------------------------------------------------------
def _slab_layout(d_model, d_ff, num_layers, o_pad):
    """Row offsets of every weight inside the packed (rows, cols) f32 slab."""
    cols = _round_up(max(3 * d_model, d_ff, d_model, o_pad, LANE), LANE)
    rows = {}
    off = 0
    for l in range(num_layers):
        rows[("wqkv", l)] = off; off += d_model          # (D, 3D)
        rows[("wo", l)] = off;   off += d_model          # (D, D)
        rows[("w1", l)] = off;   off += d_model          # (D, F)
        rows[("w2", l)] = off;   off += d_ff             # (F, D)
        rows[("g1", l)] = off;   off += 8                # (1, D), 8-aligned
        rows[("g2", l)] = off;   off += 8                # (1, D), 8-aligned
    rows["wout"] = off; off += d_model                   # (D, o_pad)
    total_rows = _round_up(off, 8)
    return rows, total_rows, cols


def pack_weights(params):
    """Pack all weights into one lane-dense f32 slab.  Call ONCE at init."""
    L, D, _ = params["wqkv"].shape
    F = params["w1"].shape[-1]
    O = params["wout"].shape[-1]
    o_pad = _round_up(max(O, LANE), LANE)
    rows, R, C = _slab_layout(D, F, L, o_pad)
    slab = np.zeros((R, C), np.float32)
    for l in range(L):
        r = rows[("wqkv", l)]; slab[r:r + D, :3 * D] = np.asarray(params["wqkv"][l])
        r = rows[("wo", l)];   slab[r:r + D, :D] = np.asarray(params["wo"][l])
        r = rows[("w1", l)];   slab[r:r + D, :F] = np.asarray(params["w1"][l])
        r = rows[("w2", l)];   slab[r:r + F, :D] = np.asarray(params["w2"][l])
        slab[rows[("g1", l)], :D] = np.asarray(params["g1"][l]).reshape(-1)
        slab[rows[("g2", l)], :D] = np.asarray(params["g2"][l]).reshape(-1)
    r = rows["wout"]; slab[r:r + D, :O] = np.asarray(params["wout"])
    return jnp.asarray(slab)


def build_mask_bias(seq_len, batch):
    """Static additive bias: 0 for same-batch (s*B+b row layout), -1e30 else."""
    n = seq_len * batch
    b = np.arange(n) % batch
    bias = np.where(b[:, None] == b[None, :], 0.0, -1e30).astype(np.float32)
    return jnp.asarray(bias)


# ----------------------------------------------------------------------------
# Kernel
# ----------------------------------------------------------------------------
def _layer_norm(y, gamma):
    # One-pass form: the two cross-lane reduces (sum(y), sum(y*y)) can overlap.
    mu = jnp.mean(y, axis=-1, keepdims=True)
    ms = jnp.mean(y * y, axis=-1, keepdims=True)
    var = jnp.maximum(ms - mu * mu, 0.0)
    return (y - mu) * jax.lax.rsqrt(var + LN_EPS) * gamma


def transformer_kernel(x_ref, w_ref, mask_ref, o_ref, *,
                       d_model, d_ff, num_layers, nhead, o_pad, rows):
    D, F = d_model, d_ff
    hd = D // nhead
    scale = 1.0 / float(np.sqrt(hd))

    x = x_ref[...].astype(jnp.float32)          # (N, D), N = S*B
    mask = mask_ref[...]                        # (N, N) additive bias
    N = x.shape[0]

    for l in range(num_layers):                 # static unroll (L = 2)
        r = rows[("wqkv", l)]; wqkv = w_ref[r:r + D, 0:3 * D]
        r_wo = rows[("wo", l)]
        r = rows[("w1", l)];   w1 = w_ref[r:r + D, 0:F]
        r = rows[("w2", l)];   w2 = w_ref[r:r + F, 0:D]
        r = rows[("g1", l)];   g1 = w_ref[r:r + 1, 0:D]
        r = rows[("g2", l)];   g2 = w_ref[r:r + 1, 0:D]

        # --- multi-head self attention: fused QKV projection (1 MXU matmul) --
        qkv = jnp.dot(x, wqkv, preferred_element_type=jnp.float32)   # (N, 3D)

        attn = jnp.zeros((N, D), jnp.float32)
        for h in range(nhead):                  # static unroll (H = 2)
            qh = qkv[:, h * hd:(h + 1) * hd] * scale                 # (N, hd)
            kh = qkv[:, D + h * hd:D + (h + 1) * hd]                 # (N, hd)
            vh = qkv[:, 2 * D + h * hd:2 * D + (h + 1) * hd]         # (N, hd)
            # scores = qh @ kh^T (contract over head dim, no transpose)
            s = jax.lax.dot_general(qh, kh, (((1,), (1,)), ((), ())),
                                    preferred_element_type=jnp.float32)
            s = s + mask                        # block cross-batch (single vadd)
            s = s - jnp.max(s, axis=-1, keepdims=True)
            p = jnp.exp(s)
            p = p * pl.reciprocal(jnp.sum(p, axis=-1, keepdims=True),
                                  approx=True)
            ctx = jnp.dot(p, vh, preferred_element_type=jnp.float32)  # (N, hd)
            # Head-concat folded into the output projection: per-head partial
            # products of wo (8-aligned row slices) summed on the VPU.
            wo_h = w_ref[r_wo + h * hd:r_wo + (h + 1) * hd, 0:D]
            attn = attn + jnp.dot(ctx, wo_h, preferred_element_type=jnp.float32)

        x = _layer_norm(x + attn, g1)

        # --- feed-forward -----------------------------------------------------
        h1 = jnp.maximum(jnp.dot(x, w1, preferred_element_type=jnp.float32), 0.0)
        ff = jnp.dot(h1, w2, preferred_element_type=jnp.float32)
        x = _layer_norm(x + ff, g2)

    # Final projection onto a lane-dense (128-lane, zero-padded) output slab.
    r = rows["wout"]
    wout = w_ref[r:r + D, 0:o_pad]
    o_ref[...] = jnp.dot(x, wout, preferred_element_type=jnp.float32).astype(o_ref.dtype)


# ----------------------------------------------------------------------------
# Hot-path forward (jit this; weight slab / mask are prebuilt)
# ----------------------------------------------------------------------------
def transformer_forward(x_sbd, w_slab, mask_bias, *, d_ff, out_dim,
                        num_layers, nhead):
    """x_sbd: (S, B, D) f32  ->  (S, B, out_dim) f32 (batch_first=False)."""
    S, B, D = x_sbd.shape
    N = S * B
    o_pad = _round_up(max(out_dim, LANE), LANE)
    rows, _, _ = _slab_layout(D, d_ff, num_layers, o_pad)

    # (S, B, D) -> (N, D) is a free row-major reshape (no HBM transpose).
    x2d = x_sbd.reshape(N, D)

    kernel = functools.partial(
        transformer_kernel, d_model=D, d_ff=d_ff, num_layers=num_layers,
        nhead=nhead, o_pad=o_pad, rows=rows)

    # No grid: single invocation, whole arrays resident in VMEM, no
    # double-buffering / pipeline bookkeeping.
    vmem_spec = pl.BlockSpec(memory_space=pltpu.MemorySpace.VMEM)
    out2d = pl.pallas_call(
        kernel,
        out_shape=jax.ShapeDtypeStruct((N, o_pad), jnp.float32),
        in_specs=[vmem_spec, vmem_spec, vmem_spec],
        out_specs=vmem_spec,
    )(x2d, w_slab, mask_bias)

    return out2d[:, :out_dim].reshape(S, B, out_dim)


# ----------------------------------------------------------------------------
# Pure-JAX reference (unsplit weights, two-pass LayerNorm) for correctness
# ----------------------------------------------------------------------------
def _layer_norm_ref(y, gamma):
    mu = jnp.mean(y, axis=-1, keepdims=True)
    var = jnp.mean((y - mu) ** 2, axis=-1, keepdims=True)
    return (y - mu) * jax.lax.rsqrt(var + LN_EPS) * gamma


def reference_forward(x_sbd, params):
    x = jnp.transpose(x_sbd, (1, 0, 2)).astype(jnp.float32)   # (B, S, D)
    B, S, D = x.shape
    hd = D // NHEAD
    scale = 1.0 / float(np.sqrt(hd))
    for l in range(NUM_LAYERS):
        qkv = x @ params["wqkv"][l]
        q, k, v = qkv[..., :D], qkv[..., D:2 * D], qkv[..., 2 * D:]
        q = q.reshape(B, S, NHEAD, hd) * scale
        k = k.reshape(B, S, NHEAD, hd)
        v = v.reshape(B, S, NHEAD, hd)
        s = jnp.einsum("bqhd,bkhd->bhqk", q, k)
        p = jax.nn.softmax(s, axis=-1)
        a = jnp.einsum("bhqk,bkhd->bqhd", p, v).reshape(B, S, D)
        a = a @ params["wo"][l]
        x = _layer_norm_ref(x + a, params["g1"][l])
        ff = jnp.maximum(x @ params["w1"][l], 0.0) @ params["w2"][l]
        x = _layer_norm_ref(x + ff, params["g2"][l])
    out = x @ params["wout"]
    return jnp.transpose(out, (1, 0, 2))


def init_params(key, d_model, d_ff, d_out, num_layers=NUM_LAYERS):
    ks = jax.random.split(key, 5)

    def u(k, shape, fan_in):
        lim = 1.0 / np.sqrt(fan_in)
        return jax.random.uniform(k, shape, jnp.float32, -lim, lim)

    return dict(
        wqkv=u(ks[0], (num_layers, d_model, 3 * d_model), d_model),
        wo=u(ks[1], (num_layers, d_model, d_model), d_model),
        w1=u(ks[2], (num_layers, d_model, d_ff), d_model),
        w2=u(ks[3], (num_layers, d_ff, d_model), d_ff),
        g1=jnp.ones((num_layers, 1, d_model), jnp.float32),
        g2=jnp.ones((num_layers, 1, d_model), jnp.float32),
        wout=u(ks[4], (d_model, d_out), d_model),
    )


if __name__ == "__main__":
    # input_dim = hidden_dim = 32 (required for output_fc shapes to line up),
    # output_dim = 16, seq = 8, batch = 2, nhead = 2, num_layers = 2.
    S, B, D, F, O = 8, 2, 32, 32, 16
    key = jax.random.PRNGKey(0)
    kx, kp = jax.random.split(key)
    x = jax.random.normal(kx, (S, B, D), jnp.float32)
    params = init_params(kp, D, F, O)

    # One-time preprocessing (NOT in the per-call hot path).
    w_slab = pack_weights(params)
    mask_bias = build_mask_bias(S, B)

    fwd = jax.jit(transformer_forward,
                  static_argnames=("d_ff", "out_dim", "num_layers", "nhead"))
    out = fwd(x, w_slab, mask_bias, d_ff=F, out_dim=O,
              num_layers=NUM_LAYERS, nhead=NHEAD)
    out = jax.block_until_ready(out)

    ref = reference_forward(x, params)
    # approx=True softmax reciprocal loosens parity slightly vs. exact divide.
    np.testing.assert_allclose(np.asarray(out), np.asarray(ref),
                               rtol=1e-3, atol=1e-3)
    assert out.shape == (S, B, O)
    print("KERNEL_OK")
</pallas_src>

<mosaic_0001>
module attributes {stable_mosaic.version = 11 : i64} {
  func.func @transformer_kernel(%arg0: memref<16x32xf32, #tpu.memory_space<vmem>>, %arg1: memref<320x128xf32, #tpu.memory_space<vmem>>, %arg2: memref<16x16xf32, #tpu.memory_space<vmem>>, %arg3: memref<16x128xf32, #tpu.memory_space<vmem>>) attributes {dimension_semantics = [], scalar_prefetch = 0 : i64, scratch_operands = 0 : i64, tpu.core_type = #tpu.core_type<tc>} {
    %c0 = arith.constant 0 : index
    %c0_0 = arith.constant 0 : index
    %0 = vector.load %arg0[%c0, %c0_0] : memref<16x32xf32, #tpu.memory_space<vmem>>, vector<16x32xf32>
    %c0_1 = arith.constant 0 : index
    %c0_2 = arith.constant 0 : index
    %1 = vector.load %arg2[%c0_1, %c0_2] : memref<16x16xf32, #tpu.memory_space<vmem>>, vector<16x16xf32>
    %c0_3 = arith.constant 0 : index
    %c0_4 = arith.constant 0 : index
    %2 = vector.load %arg1[%c0_3, %c0_4] : memref<320x128xf32, #tpu.memory_space<vmem>>, vector<32x96xf32>
    %c64 = arith.constant 64 : index
    %c0_5 = arith.constant 0 : index
    %3 = vector.load %arg1[%c64, %c0_5] : memref<320x128xf32, #tpu.memory_space<vmem>>, vector<32x32xf32>
    %c96 = arith.constant 96 : index
    %c0_6 = arith.constant 0 : index
    %4 = vector.load %arg1[%c96, %c0_6] : memref<320x128xf32, #tpu.memory_space<vmem>>, vector<32x32xf32>
    %c128 = arith.constant 128 : index
    %c0_7 = arith.constant 0 : index
    %5 = vector.load %arg1[%c128, %c0_7] : memref<320x128xf32, #tpu.memory_space<vmem>>, vector<1x32xf32>
    %c136 = arith.constant 136 : index
    %c0_8 = arith.constant 0 : index
    %6 = vector.load %arg1[%c136, %c0_8] : memref<320x128xf32, #tpu.memory_space<vmem>>, vector<1x32xf32>
    %cst = arith.constant dense<0.000000e+00> : vector<16x96xf32>
    %7 = tpu.matmul %0, %2, %cst {dimension_numbers = #tpu.dot_dimension_numbers<[1], [0], [0], [1], [0, 0, 1, 1], [], []>} : vector<16x32xf32>, vector<32x96xf32>, vector<16x96xf32> -> vector<16x96xf32>
    %cst_9 = arith.constant 0.000000e+00 : f32
    %8 = vector.broadcast %cst_9 : f32 to vector<16x32xf32>
    %9 = vector.extract_strided_slice %7 {offsets = [0, 0], sizes = [16, 16], strides = [1, 1]} : vector<16x96xf32> to vector<16x16xf32>
    %cst_10 = arith.constant 2.500000e-01 : f32
    %10 = vector.broadcast %cst_10 : f32 to vector<16x16xf32>
    %11 = arith.mulf %9, %10 : vector<16x16xf32>
    %12 = vector.extract_strided_slice %7 {offsets = [0, 32], sizes = [16, 16], strides = [1, 1]} : vector<16x96xf32> to vector<16x16xf32>
    %13 = vector.extract_strided_slice %7 {offsets = [0, 64], sizes = [16, 16], strides = [1, 1]} : vector<16x96xf32> to vector<16x16xf32>
    %cst_11 = arith.constant dense<0.000000e+00> : vector<16x16xf32>
    %14 = tpu.matmul %11, %12, %cst_11 {dimension_numbers = #tpu.dot_dimension_numbers<[1], [1], [0], [0], [0, 0, 1, 0], [], []>} : vector<16x16xf32>, vector<16x16xf32>, vector<16x16xf32> -> vector<16x16xf32>
    %15 = arith.addf %14, %1 : vector<16x16xf32>
    %cst_12 = arith.constant dense<0xFF800000> : vector<16xf32>
    %16 = vector.multi_reduction <maximumf>, %15, %cst_12 [1] : vector<16x16xf32> to vector<16xf32>
    %17 = vector.shape_cast %16 : vector<16xf32> to vector<16x1xf32>
    %18 = vector.broadcast %17 : vector<16x1xf32> to vector<16x16xf32>
    %19 = arith.subf %15, %18 : vector<16x16xf32>
    %20 = math.exp %19 : vector<16x16xf32>
    %cst_13 = arith.constant dense<0.000000e+00> : vector<16xf32>
    %21 = vector.multi_reduction <add>, %20, %cst_13 [1] : vector<16x16xf32> to vector<16xf32>
    %22 = vector.shape_cast %21 : vector<16xf32> to vector<16x1xf32>
    %23 = tpu.reciprocal %22 {approx = true} : vector<16x1xf32> -> vector<16x1xf32>
    %24 = vector.broadcast %23 : vector<16x1xf32> to vector<16x16xf32>
    %25 = arith.mulf %20, %24 : vector<16x16xf32>
    %cst_14 = arith.constant dense<0.000000e+00> : vector<16x16xf32>
    %26 = tpu.matmul %25, %13, %cst_14 {dimension_numbers = #tpu.dot_dimension_numbers<[1], [0], [0], [1], [0, 0, 1, 1], [], []>} : vector<16x16xf32>, vector<16x16xf32>, vector<16x16xf32> -> vector<16x16xf32>
    %c32 = arith.constant 32 : index
    %c0_15 = arith.constant 0 : index
    %27 = vector.load %arg1[%c32, %c0_15] : memref<320x128xf32, #tpu.memory_space<vmem>>, vector<16x32xf32>
    %cst_16 = arith.constant dense<0.000000e+00> : vector<16x32xf32>
    %28 = tpu.matmul %26, %27, %cst_16 {dimension_numbers = #tpu.dot_dimension_numbers<[1], [0], [0], [1], [0, 0, 1, 1], [], []>} : vector<16x16xf32>, vector<16x32xf32>, vector<16x32xf32> -> vector<16x32xf32>
    %29 = arith.addf %8, %28 : vector<16x32xf32>
    %30 = vector.extract_strided_slice %7 {offsets = [0, 16], sizes = [16, 16], strides = [1, 1]} : vector<16x96xf32> to vector<16x16xf32>
    %cst_17 = arith.constant 2.500000e-01 : f32
    %31 = vector.broadcast %cst_17 : f32 to vector<16x16xf32>
    %32 = arith.mulf %30, %31 : vector<16x16xf32>
    %33 = vector.extract_strided_slice %7 {offsets = [0, 48], sizes = [16, 16], strides = [1, 1]} : vector<16x96xf32> to vector<16x16xf32>
    %34 = vector.extract_strided_slice %7 {offsets = [0, 80], sizes = [16, 16], strides = [1, 1]} : vector<16x96xf32> to vector<16x16xf32>
    %cst_18 = arith.constant dense<0.000000e+00> : vector<16x16xf32>
    %35 = tpu.matmul %32, %33, %cst_18 {dimension_numbers = #tpu.dot_dimension_numbers<[1], [1], [0], [0], [0, 0, 1, 0], [], []>} : vector<16x16xf32>, vector<16x16xf32>, vector<16x16xf32> -> vector<16x16xf32>
    %36 = arith.addf %35, %1 : vector<16x16xf32>
    %cst_19 = arith.constant dense<0xFF800000> : vector<16xf32>
    %37 = vector.multi_reduction <maximumf>, %36, %cst_19 [1] : vector<16x16xf32> to vector<16xf32>
    %38 = vector.shape_cast %37 : vector<16xf32> to vector<16x1xf32>
    %39 = vector.broadcast %38 : vector<16x1xf32> to vector<16x16xf32>
    %40 = arith.subf %36, %39 : vector<16x16xf32>
    %41 = math.exp %40 : vector<16x16xf32>
    %cst_20 = arith.constant dense<0.000000e+00> : vector<16xf32>
    %42 = vector.multi_reduction <add>, %41, %cst_20 [1] : vector<16x16xf32> to vector<16xf32>
    %43 = vector.shape_cast %42 : vector<16xf32> to vector<16x1xf32>
    %44 = tpu.reciprocal %43 {approx = true} : vector<16x1xf32> -> vector<16x1xf32>
    %45 = vector.broadcast %44 : vector<16x1xf32> to vector<16x16xf32>
    %46 = arith.mulf %41, %45 : vector<16x16xf32>
    %cst_21 = arith.constant dense<0.000000e+00> : vector<16x16xf32>
    %47 = tpu.matmul %46, %34, %cst_21 {dimension_numbers = #tpu.dot_dimension_numbers<[1], [0], [0], [1], [0, 0, 1, 1], [], []>} : vector<16x16xf32>, vector<16x16xf32>, vector<16x16xf32> -> vector<16x16xf32>
    %c48 = arith.constant 48 : index
    %c0_22 = arith.constant 0 : index
    %48 = vector.load %arg1[%c48, %c0_22] : memref<320x128xf32, #tpu.memory_space<vmem>>, vector<16x32xf32>
    %cst_23 = arith.constant dense<0.000000e+00> : vector<16x32xf32>
    %49 = tpu.matmul %47, %48, %cst_23 {dimension_numbers = #tpu.dot_dimension_numbers<[1], [0], [0], [1], [0, 0, 1, 1], [], []>} : vector<16x16xf32>, vector<16x32xf32>, vector<16x32xf32> -> vector<16x32xf32>
    %50 = arith.addf %29, %49 : vector<16x32xf32>
    %51 = arith.addf %0, %50 : vector<16x32xf32>
    %cst_24 = arith.constant dense<0.000000e+00> : vector<16xf32>
    %52 = vector.multi_reduction <add>, %51, %cst_24 [1] : vector<16x32xf32> to vector<16xf32>
    %53 = vector.shape_cast %52 : vector<16xf32> to vector<16x1xf32>
    %cst_25 = arith.constant 3.200000e+01 : f32
    %54 = vector.broadcast %cst_25 : f32 to vector<16x1xf32>
    %55 = arith.divf %53, %54 : vector<16x1xf32>
    %56 = arith.mulf %51, %51 : vector<16x32xf32>
    %cst_26 = arith.constant dense<0.000000e+00> : vector<16xf32>
    %57 = vector.multi_reduction <add>, %56, %cst_26 [1] : vector<16x32xf32> to vector<16xf32>
    %58 = vector.shape_cast %57 : vector<16xf32> to vector<16x1xf32>
    %cst_27 = arith.constant 3.200000e+01 : f32
    %59 = vector.broadcast %cst_27 : f32 to vector<16x1xf32>
    %60 = arith.divf %58, %59 : vector<16x1xf32>
    %61 = arith.mulf %55, %55 : vector<16x1xf32>
    %62 = arith.subf %60, %61 : vector<16x1xf32>
    %cst_28 = arith.constant 0.000000e+00 : f32
    %63 = vector.broadcast %cst_28 : f32 to vector<16x1xf32>
    %64 = arith.maximumf %62, %63 : vector<16x1xf32>
    %65 = vector.broadcast %55 : vector<16x1xf32> to vector<16x32xf32>
    %66 = arith.subf %51, %65 : vector<16x32xf32>
    %cst_29 = arith.constant 9.99999974E-6 : f32
    %67 = vector.broadcast %cst_29 : f32 to vector<16x1xf32>
    %68 = arith.addf %64, %67 : vector<16x1xf32>
    %69 = math.rsqrt %68 : vector<16x1xf32>
    %70 = vector.broadcast %69 : vector<16x1xf32> to vector<16x32xf32>
    %71 = arith.mulf %66, %70 : vector<16x32xf32>
    %72 = vector.broadcast %5 : vector<1x32xf32> to vector<16x32xf32>
    %73 = arith.mulf %71, %72 : vector<16x32xf32>
    %cst_30 = arith.constant dense<0.000000e+00> : vector<16x32xf32>
    %74 = tpu.matmul %73, %3, %cst_30 {dimension_numbers = #tpu.dot_dimension_numbers<[1], [0], [0], [1], [0, 0, 1, 1], [], []>} : vector<16x32xf32>, vector<32x32xf32>, vector<16x32xf32> -> vector<16x32xf32>
    %cst_31 = arith.constant 0.000000e+00 : f32
    %75 = vector.broadcast %cst_31 : f32 to vector<16x32xf32>
    %76 = arith.maximumf %74, %75 : vector<16x32xf32>
    %cst_32 = arith.constant dense<0.000000e+00> : vector<16x32xf32>
    %77 = tpu.matmul %76, %4, %cst_32 {dimension_numbers = #tpu.dot_dimension_numbers<[1], [0], [0], [1], [0, 0, 1, 1], [], []>} : vector<16x32xf32>, vector<32x32xf32>, vector<16x32xf32> -> vector<16x32xf32>
    %78 = arith.addf %73, %77 : vector<16x32xf32>
    %cst_33 = arith.constant dense<0.000000e+00> : vector<16xf32>
    %79 = vector.multi_reduction <add>, %78, %cst_33 [1] : vector<16x32xf32> to vector<16xf32>
    %80 = vector.shape_cast %79 : vector<16xf32> to vector<16x1xf32>
    %cst_34 = arith.constant 3.200000e+01 : f32
    %81 = vector.broadcast %cst_34 : f32 to vector<16x1xf32>
    %82 = arith.divf %80, %81 : vector<16x1xf32>
    %83 = arith.mulf %78, %78 : vector<16x32xf32>
    %cst_35 = arith.constant dense<0.000000e+00> : vector<16xf32>
    %84 = vector.multi_reduction <add>, %83, %cst_35 [1] : vector<16x32xf32> to vector<16xf32>
    %85 = vector.shape_cast %84 : vector<16xf32> to vector<16x1xf32>
    %cst_36 = arith.constant 3.200000e+01 : f32
    %86 = vector.broadcast %cst_36 : f32 to vector<16x1xf32>
    %87 = arith.divf %85, %86 : vector<16x1xf32>
    %88 = arith.mulf %82, %82 : vector<16x1xf32>
    %89 = arith.subf %87, %88 : vector<16x1xf32>
    %cst_37 = arith.constant 0.000000e+00 : f32
    %90 = vector.broadcast %cst_37 : f32 to vector<16x1xf32>
    %91 = arith.maximumf %89, %90 : vector<16x1xf32>
    %92 = vector.broadcast %82 : vector<16x1xf32> to vector<16x32xf32>
    %93 = arith.subf %78, %92 : vector<16x32xf32>
    %cst_38 = arith.constant 9.99999974E-6 : f32
    %94 = vector.broadcast %cst_38 : f32 to vector<16x1xf32>
    %95 = arith.addf %91, %94 : vector<16x1xf32>
    %96 = math.rsqrt %95 : vector<16x1xf32>
    %97 = vector.broadcast %96 : vector<16x1xf32> to vector<16x32xf32>
    %98 = arith.mulf %93, %97 : vector<16x32xf32>
    %99 = vector.broadcast %6 : vector<1x32xf32> to vector<16x32xf32>
    %100 = arith.mulf %98, %99 : vector<16x32xf32>
    %c144 = arith.constant 144 : index
    %c0_39 = arith.constant 0 : index
    %101 = vector.load %arg1[%c144, %c0_39] : memref<320x128xf32, #tpu.memory_space<vmem>>, vector<32x96xf32>
    %c208 = arith.constant 208 : index
    %c0_40 = arith.constant 0 : index
    %102 = vector.load %arg1[%c208, %c0_40] : memref<320x128xf32, #tpu.memory_space<vmem>>, vector<32x32xf32>
    %c240 = arith.constant 240 : index
    %c0_41 = arith.constant 0 : index
    %103 = vector.load %arg1[%c240, %c0_41] : memref<320x128xf32, #tpu.memory_space<vmem>>, vector<32x32xf32>
    %c272 = arith.constant 272 : index
    %c0_42 = arith.constant 0 : index
    %104 = vector.load %arg1[%c272, %c0_42] : memref<320x128xf32, #tpu.memory_space<vmem>>, vector<1x32xf32>
    %c280 = arith.constant 280 : index
    %c0_43 = arith.constant 0 : index
    %105 = vector.load %arg1[%c280, %c0_43] : memref<320x128xf32, #tpu.memory_space<vmem>>, vector<1x32xf32>
    %cst_44 = arith.constant dense<0.000000e+00> : vector<16x96xf32>
    %106 = tpu.matmul %100, %101, %cst_44 {dimension_numbers = #tpu.dot_dimension_numbers<[1], [0], [0], [1], [0, 0, 1, 1], [], []>} : vector<16x32xf32>, vector<32x96xf32>, vector<16x96xf32> -> vector<16x96xf32>
    %cst_45 = arith.constant 0.000000e+00 : f32
    %107 = vector.broadcast %cst_45 : f32 to vector<16x32xf32>
    %108 = vector.extract_strided_slice %106 {offsets = [0, 0], sizes = [16, 16], strides = [1, 1]} : vector<16x96xf32> to vector<16x16xf32>
    %cst_46 = arith.constant 2.500000e-01 : f32
    %109 = vector.broadcast %cst_46 : f32 to vector<16x16xf32>
    %110 = arith.mulf %108, %109 : vector<16x16xf32>
    %111 = vector.extract_strided_slice %106 {offsets = [0, 32], sizes = [16, 16], strides = [1, 1]} : vector<16x96xf32> to vector<16x16xf32>
    %112 = vector.extract_strided_slice %106 {offsets = [0, 64], sizes = [16, 16], strides = [1, 1]} : vector<16x96xf32> to vector<16x16xf32>
    %cst_47 = arith.constant dense<0.000000e+00> : vector<16x16xf32>
    %113 = tpu.matmul %110, %111, %cst_47 {dimension_numbers = #tpu.dot_dimension_numbers<[1], [1], [0], [0], [0, 0, 1, 0], [], []>} : vector<16x16xf32>, vector<16x16xf32>, vector<16x16xf32> -> vector<16x16xf32>
    %114 = arith.addf %113, %1 : vector<16x16xf32>
    %cst_48 = arith.constant dense<0xFF800000> : vector<16xf32>
    %115 = vector.multi_reduction <maximumf>, %114, %cst_48 [1] : vector<16x16xf32> to vector<16xf32>
    %116 = vector.shape_cast %115 : vector<16xf32> to vector<16x1xf32>
    %117 = vector.broadcast %116 : vector<16x1xf32> to vector<16x16xf32>
    %118 = arith.subf %114, %117 : vector<16x16xf32>
    %119 = math.exp %118 : vector<16x16xf32>
    %cst_49 = arith.constant dense<0.000000e+00> : vector<16xf32>
    %120 = vector.multi_reduction <add>, %119, %cst_49 [1] : vector<16x16xf32> to vector<16xf32>
    %121 = vector.shape_cast %120 : vector<16xf32> to vector<16x1xf32>
    %122 = tpu.reciprocal %121 {approx = true} : vector<16x1xf32> -> vector<16x1xf32>
    %123 = vector.broadcast %122 : vector<16x1xf32> to vector<16x16xf32>
    %124 = arith.mulf %119, %123 : vector<16x16xf32>
    %cst_50 = arith.constant dense<0.000000e+00> : vector<16x16xf32>
    %125 = tpu.matmul %124, %112, %cst_50 {dimension_numbers = #tpu.dot_dimension_numbers<[1], [0], [0], [1], [0, 0, 1, 1], [], []>} : vector<16x16xf32>, vector<16x16xf32>, vector<16x16xf32> -> vector<16x16xf32>
    %c176 = arith.constant 176 : index
    %c0_51 = arith.constant 0 : index
    %126 = vector.load %arg1[%c176, %c0_51] : memref<320x128xf32, #tpu.memory_space<vmem>>, vector<16x32xf32>
    %cst_52 = arith.constant dense<0.000000e+00> : vector<16x32xf32>
    %127 = tpu.matmul %125, %126, %cst_52 {dimension_numbers = #tpu.dot_dimension_numbers<[1], [0], [0], [1], [0, 0, 1, 1], [], []>} : vector<16x16xf32>, vector<16x32xf32>, vector<16x32xf32> -> vector<16x32xf32>
    %128 = arith.addf %107, %127 : vector<16x32xf32>
    %129 = vector.extract_strided_slice %106 {offsets = [0, 16], sizes = [16, 16], strides = [1, 1]} : vector<16x96xf32> to vector<16x16xf32>
    %cst_53 = arith.constant 2.500000e-01 : f32
    %130 = vector.broadcast %cst_53 : f32 to vector<16x16xf32>
    %131 = arith.mulf %129, %130 : vector<16x16xf32>
    %132 = vector.extract_strided_slice %106 {offsets = [0, 48], sizes = [16, 16], strides = [1, 1]} : vector<16x96xf32> to vector<16x16xf32>
    %133 = vector.extract_strided_slice %106 {offsets = [0, 80], sizes = [16, 16], strides = [1, 1]} : vector<16x96xf32> to vector<16x16xf32>
    %cst_54 = arith.constant dense<0.000000e+00> : vector<16x16xf32>
    %134 = tpu.matmul %131, %132, %cst_54 {dimension_numbers = #tpu.dot_dimension_numbers<[1], [1], [0], [0], [0, 0, 1, 0], [], []>} : vector<16x16xf32>, vector<16x16xf32>, vector<16x16xf32> -> vector<16x16xf32>
    %135 = arith.addf %134, %1 : vector<16x16xf32>
    %cst_55 = arith.constant dense<0xFF800000> : vector<16xf32>
    %136 = vector.multi_reduction <maximumf>, %135, %cst_55 [1] : vector<16x16xf32> to vector<16xf32>
    %137 = vector.shape_cast %136 : vector<16xf32> to vector<16x1xf32>
    %138 = vector.broadcast %137 : vector<16x1xf32> to vector<16x16xf32>
    %139 = arith.subf %135, %138 : vector<16x16xf32>
    %140 = math.exp %139 : vector<16x16xf32>
    %cst_56 = arith.constant dense<0.000000e+00> : vector<16xf32>
    %141 = vector.multi_reduction <add>, %140, %cst_56 [1] : vector<16x16xf32> to vector<16xf32>
    %142 = vector.shape_cast %141 : vector<16xf32> to vector<16x1xf32>
    %143 = tpu.reciprocal %142 {approx = true} : vector<16x1xf32> -> vector<16x1xf32>
    %144 = vector.broadcast %143 : vector<16x1xf32> to vector<16x16xf32>
    %145 = arith.mulf %140, %144 : vector<16x16xf32>
    %cst_57 = arith.constant dense<0.000000e+00> : vector<16x16xf32>
    %146 = tpu.matmul %145, %133, %cst_57 {dimension_numbers = #tpu.dot_dimension_numbers<[1], [0], [0], [1], [0, 0, 1, 1], [], []>} : vector<16x16xf32>, vector<16x16xf32>, vector<16x16xf32> -> vector<16x16xf32>
    %c192 = arith.constant 192 : index
    %c0_58 = arith.constant 0 : index
    %147 = vector.load %arg1[%c192, %c0_58] : memref<320x128xf32, #tpu.memory_space<vmem>>, vector<16x32xf32>
    %cst_59 = arith.constant dense<0.000000e+00> : vector<16x32xf32>
    %148 = tpu.matmul %146, %147, %cst_59 {dimension_numbers = #tpu.dot_dimension_numbers<[1], [0], [0], [1], [0, 0, 1, 1], [], []>} : vector<16x16xf32>, vector<16x32xf32>, vector<16x32xf32> -> vector<16x32xf32>
    %149 = arith.addf %128, %148 : vector<16x32xf32>
    %150 = arith.addf %100, %149 : vector<16x32xf32>
    %cst_60 = arith.constant dense<0.000000e+00> : vector<16xf32>
    %151 = vector.multi_reduction <add>, %150, %cst_60 [1] : vector<16x32xf32> to vector<16xf32>
    %152 = vector.shape_cast %151 : vector<16xf32> to vector<16x1xf32>
    %cst_61 = arith.constant 3.200000e+01 : f32
    %153 = vector.broadcast %cst_61 : f32 to vector<16x1xf32>
    %154 = arith.divf %152, %153 : vector<16x1xf32>
    %155 = arith.mulf %150, %150 : vector<16x32xf32>
    %cst_62 = arith.constant dense<0.000000e+00> : vector<16xf32>
    %156 = vector.multi_reduction <add>, %155, %cst_62 [1] : vector<16x32xf32> to vector<16xf32>
    %157 = vector.shape_cast %156 : vector<16xf32> to vector<16x1xf32>
    %cst_63 = arith.constant 3.200000e+01 : f32
    %158 = vector.broadcast %cst_63 : f32 to vector<16x1xf32>
    %159 = arith.divf %157, %158 : vector<16x1xf32>
    %160 = arith.mulf %154, %154 : vector<16x1xf32>
    %161 = arith.subf %159, %160 : vector<16x1xf32>
    %cst_64 = arith.constant 0.000000e+00 : f32
    %162 = vector.broadcast %cst_64 : f32 to vector<16x1xf32>
    %163 = arith.maximumf %161, %162 : vector<16x1xf32>
    %164 = vector.broadcast %154 : vector<16x1xf32> to vector<16x32xf32>
    %165 = arith.subf %150, %164 : vector<16x32xf32>
    %cst_65 = arith.constant 9.99999974E-6 : f32
    %166 = vector.broadcast %cst_65 : f32 to vector<16x1xf32>
    %167 = arith.addf %163, %166 : vector<16x1xf32>
    %168 = math.rsqrt %167 : vector<16x1xf32>
    %169 = vector.broadcast %168 : vector<16x1xf32> to vector<16x32xf32>
    %170 = arith.mulf %165, %169 : vector<16x32xf32>
    %171 = vector.broadcast %104 : vector<1x32xf32> to vector<16x32xf32>
    %172 = arith.mulf %170, %171 : vector<16x32xf32>
    %cst_66 = arith.constant dense<0.000000e+00> : vector<16x32xf32>
    %173 = tpu.matmul %172, %102, %cst_66 {dimension_numbers = #tpu.dot_dimension_numbers<[1], [0], [0], [1], [0, 0, 1, 1], [], []>} : vector<16x32xf32>, vector<32x32xf32>, vector<16x32xf32> -> vector<16x32xf32>
    %cst_67 = arith.constant 0.000000e+00 : f32
    %174 = vector.broadcast %cst_67 : f32 to vector<16x32xf32>
    %175 = arith.maximumf %173, %174 : vector<16x32xf32>
    %cst_68 = arith.constant dense<0.000000e+00> : vector<16x32xf32>
    %176 = tpu.matmul %175, %103, %cst_68 {dimension_numbers = #tpu.dot_dimension_numbers<[1], [0], [0], [1], [0, 0, 1, 1], [], []>} : vector<16x32xf32>, vector<32x32xf32>, vector<16x32xf32> -> vector<16x32xf32>
    %177 = arith.addf %172, %176 : vector<16x32xf32>
    %cst_69 = arith.constant dense<0.000000e+00> : vector<16xf32>
    %178 = vector.multi_reduction <add>, %177, %cst_69 [1] : vector<16x32xf32> to vector<16xf32>
    %179 = vector.shape_cast %178 : vector<16xf32> to vector<16x1xf32>
    %cst_70 = arith.constant 3.200000e+01 : f32
    %180 = vector.broadcast %cst_70 : f32 to vector<16x1xf32>
    %181 = arith.divf %179, %180 : vector<16x1xf32>
    %182 = arith.mulf %177, %177 : vector<16x32xf32>
    %cst_71 = arith.constant dense<0.000000e+00> : vector<16xf32>
    %183 = vector.multi_reduction <add>, %182, %cst_71 [1] : vector<16x32xf32> to vector<16xf32>
    %184 = vector.shape_cast %183 : vector<16xf32> to vector<16x1xf32>
    %cst_72 = arith.constant 3.200000e+01 : f32
    %185 = vector.broadcast %cst_72 : f32 to vector<16x1xf32>
    %186 = arith.divf %184, %185 : vector<16x1xf32>
    %187 = arith.mulf %181, %181 : vector<16x1xf32>
    %188 = arith.subf %186, %187 : vector<16x1xf32>
    %cst_73 = arith.constant 0.000000e+00 : f32
    %189 = vector.broadcast %cst_73 : f32 to vector<16x1xf32>
    %190 = arith.maximumf %188, %189 : vector<16x1xf32>
    %191 = vector.broadcast %181 : vector<16x1xf32> to vector<16x32xf32>
    %192 = arith.subf %177, %191 : vector<16x32xf32>
    %cst_74 = arith.constant 9.99999974E-6 : f32
    %193 = vector.broadcast %cst_74 : f32 to vector<16x1xf32>
    %194 = arith.addf %190, %193 : vector<16x1xf32>
    %195 = math.rsqrt %194 : vector<16x1xf32>
    %196 = vector.broadcast %195 : vector<16x1xf32> to vector<16x32xf32>
    %197 = arith.mulf %192, %196 : vector<16x32xf32>
    %198 = vector.broadcast %105 : vector<1x32xf32> to vector<16x32xf32>
    %199 = arith.mulf %197, %198 : vector<16x32xf32>
    %c288 = arith.constant 288 : index
    %c0_75 = arith.constant 0 : index
    %200 = vector.load %arg1[%c288, %c0_75] : memref<320x128xf32, #tpu.memory_space<vmem>>, vector<32x128xf32>
    %cst_76 = arith.constant dense<0.000000e+00> : vector<16x128xf32>
    %201 = tpu.matmul %199, %200, %cst_76 {dimension_numbers = #tpu.dot_dimension_numbers<[1], [0], [0], [1], [0, 0, 1, 1], [], []>} : vector<16x32xf32>, vector<32x128xf32>, vector<16x128xf32> -> vector<16x128xf32>
    %c0_77 = arith.constant 0 : index
    %c0_78 = arith.constant 0 : index
    %202 = vector.load %arg3[%c0_77, %c0_78] : memref<16x128xf32, #tpu.memory_space<vmem>>, vector<16x128xf32>
    tpu.vector_store %arg3[%c0_77, %c0_78], %201 {strides = array<i32>} : memref<16x128xf32, #tpu.memory_space<vmem>>, vector<16x128xf32>,
    return
  }
}

</mosaic_0001>

<bundles_post_ra>
// kernel: transformer_forward.1
= control target key start
LH: loop header
LB: loop body
LE: loop exit
PB: predicated region body
PF: predicated region fallthrough
CT: control target
= control target key end

     0   :  { %8 = vsyncpa [#allocation3], 0  ;;  %s2645_s0 = inlined_call_operand.hbm [shape: f32[16,32], index: 0, kind: input, shape index: {}]   ;;  %s2646_s1 = inlined_call_operand.hbm [shape: f32[320,128], index: 1, kind: input, shape index: {}]   ;;  %s2647_s2 = inlined_call_operand.hbm [shape: f32[16,16], index: 2, kind: input, shape index: {}]   ;;  %s2648_s3 = inlined_call_operand.hbm [shape: f32[16,128], index: 3, kind: output, shape index: {}]  }
   0x1   :  { %9 = vsyncpa [#allocation6], 0 }
   0x2   :  { %10 = vsyncpa [#allocation4], 0  ;;  %s2428_s12 = smov [#allocation5]   ;;  %s2429_s14 = smov [#allocation2]  }
   0x3   :  { %s28_s13 = sshll.u32 %s2428_s12, 4  ;;  %s16_s15 = sshll.u32 %s2429_s14, 4  ;;  %s29_s13 = int_to_ptr.vmem [resolvable:$true] %s28_s13  ;;  %s17_s15 = int_to_ptr.vmem [resolvable:$true] %s16_s15 }
   0x4   :  { %s2350_s16 = scalar_lea.vmem %s29_s13, 5120  ;;  %p2355_p1 = scmp.lt.s32.totalorder %s29_s13, %s29_s13 }
   0x5   :  { %p2351_p0 = scmp.ne.s32.totalorder %s29_s13, %s2350_s16  ;;  %p2356_p2 = scmp.lt.s32.totalorder %s2350_s16, %s2350_s16 }
   0x7   :  { %p2357_p3 = por %p2356_p2, %p2355_p1 }
   0x9   :  { %p2358_p4 = pnand %p2357_p3, %p2351_p0 }
   0xb   :  { %2361 = shalt.err (!%p2358_p4)
}
   0xc   :  { %s2430_s17 = smov 128   ;;  %s2431_s18 = smov 8  }
   0xd   :  { %34 = dma.hbm_to_vmem [thread:$0]  %s2646_s1, 5120, %s29_s13, [#allocation6], %s2430_s17, %s2430_s17, %s2431_s18  }
   0xe   :  { %s2370_s21 = scalar_lea.vmem %s17_s15, 256  ;;  %p2375_p6 = scmp.lt.s32.totalorder %s17_s15, %s17_s15 }
   0xf   :  { %p2371_p5 = scmp.ne.s32.totalorder %s17_s15, %s2370_s21  ;;  %p2376_p7 = scmp.lt.s32.totalorder %s2370_s21, %s2370_s21 }
  0x11   :  { %p2377_p8 = por %p2376_p7, %p2375_p6 }
  0x13   :  { %p2378_p9 = pnand %p2377_p8, %p2371_p5 }
  0x15   :  { %2381 = shalt.err (!%p2378_p9)
}
  0x16   :  { %22 = dma.hbm_to_vmem [thread:$0]  %s2645_s0, 256, %s17_s15, [#allocation3], %s2430_s17, %s2430_s17, %s2431_s18  }
  0x17   :  { %s2432_s24 = smov [#allocation7]  }
  0x18   :  { %s40_s25 = sshll.u32 %s2432_s24, 4  ;;  %s41_s25 = int_to_ptr.vmem [resolvable:$true] %s40_s25 }
  0x19   :  { %s2390_s26 = scalar_lea.vmem %s41_s25, 256  ;;  %p2395_p11 = scmp.lt.s32.totalorder %s41_s25, %s41_s25 }
  0x1a   :  { %p2391_p10 = scmp.ne.s32.totalorder %s41_s25, %s2390_s26  ;;  %p2396_p12 = scmp.lt.s32.totalorder %s2390_s26, %s2390_s26 }
  0x1c   :  { %p2397_p13 = por %p2396_p12, %p2395_p11 }
  0x1e   :  { %p2398_p0 = pnand %p2397_p13, %p2391_p10 }
  0x20   :  { %2401 = shalt.err (!%p2398_p0)
}
  0x21   :  { %46 = dma.hbm_to_vmem [thread:$0]  %s2647_s2, 256, %s41_s25, [#allocation6], %s2430_s17, %s2430_s17, %s2431_s18  }
  0x22   :  { %2422 = dma.done.wait [#allocation3], 256  }
  0x23   :  { %2423 = vsyncadd [#allocation3], 4294967040 }
  0x24   :  { %2424 = dma.done.wait [#allocation6], 5376  }
  0x25   :  { %2425 = vsyncadd [#allocation6], 4294961920  ;;  %vm74_vm0 = vcmask 261120   ;;  %v63_v0 = vld [vmem:[#allocation5 + $0x18] sm:$0xff]  ;;  %v62_v1 = vld [vmem:[#allocation5 + $0x10] sm:$0xff]  ;;  %s2433_s0 = smov 96  }
  0x26   :  { %2122 = vmatprep.subr.mxu0 %v63_v0  ;;  %v2477_v2 = vld [vmem:[#allocation2] sm:$0xff]  ;;  %v61_v3 = vld [vmem:[#allocation5 + $0x8] sm:$0xff]  ;;  %v60_v4 = vld [vmem:[#allocation5] sm:$0xff]  ;;  %vm164_vm1 = vcmask 130048   ;;  %s2434_s2 = smov 64   ;;  %s2435_s28 = smov 112  }
  0x27   :  { %2123 = vmatpush3.msra.mxu0 %v63_v0  ;;  %2130 = vmatprep.mubr.msk.f32.mxu0 %vm74_vm0, %v2477_v2  ;;  %v2481_v5 = vld [vmem:[#allocation2 + $0x8] sm:$0xff]  ;;  %v2501_v13 = vld [vmem:[#allocation7] sm:$0xff]  ;;  %v2503_v14 = vld [vmem:[#allocation7 + $0x8] sm:$0xff]  ;;  %s2436_s29 = smov 80   ;;  %s2437_s30 = smov 48  }
  0x28   :  { %2124 = vmatprep.subr.mxu0 %v62_v1  ;;  %v360_v42 = vld [vmem:[#allocation5 + $0x28] sm:$0xff]  ;;  %v359_v43 = vld [vmem:[#allocation5 + $0x20] sm:$0xff]  ;;  %s2438_s4 = smov [#allocation8]  }
  0x29   :  { %2125 = vmatpush3.msra.mxu0 %v62_v1  ;;  %s1969_s5 = sshll.u32 %s2438_s4, 4  ;;  %s1970_s5 = int_to_ptr.vmem [resolvable:$true] %s1969_s5 }
  0x2a   :  { %2126 = vmatprep.subr.mxu0 %v61_v3  ;;  %s2402_s6 = scalar_lea.vmem %s1970_s5, 256  ;;  %p2407_p2 = scmp.lt.s32.totalorder %s1970_s5, %s1970_s5 }
  0x2b   :  { %2127 = vmatpush3.msra.mxu0 %v61_v3  ;;  %v562_v3 = vld [vmem:[#allocation5 + $0x38] sm:$0xff]  ;;  %p2403_p1 = scmp.ne.s32.totalorder %s1970_s5, %s2402_s6  ;;  %p2408_p3 = scmp.lt.s32.totalorder %s2402_s6, %s2402_s6 }
  0x2c   :  { %2128 = vmatprep.subr.mxu0 %v60_v4 }
  0x2d   :  { %2129 = vmatpush3.msra.mxu0 %v60_v4  ;;  %p2409_p4 = por %p2408_p3, %p2407_p2 }
  0x2e   :  { %2131 = vmatmul.mubr.msk.f32.vlgmr.msra.gmra.mxu0 %vm74_vm0, %v2481_v5 }
  0x2f   :  { %p2410_p5 = pnand %p2409_p4, %p2403_p1 }
  0xee   :  { %v2485_v6 = vpop.f32.mrf.mxu0 }
  0xef   :  { %162 = vrot.lane.b32.xlu0 %v2485_v6, %s2433_s0  ;;  %v157_v11 = vmul.f32 0.25, %v2485_v6 }
  0xf0   :  { %v2489_v7 = vpop.f32.mrf.mxu0 }
  0xf1   :  { %v156_v8 = vmul.f32 0.25, %v2489_v7 }
  0xf3   :  { %160 = vrot.lane.b32.xlu0 %v2489_v7, %s2433_s0  ;;  %2137 = vmatprep.mubr.msk.f32.mxu1 %vm164_vm1, %v156_v8 }
 0x161   :  { %v163_v9 = vpop.permute.xlu0 %162 }
 0x162   :  { %2133 = vmatprep.subr.msk.mxu1 %vm164_vm1, %v163_v9 }
 0x163   :  { %2134 = vmatpush3.xpose.msk.msra.mxu1 %vm164_vm1, %v163_v9 }
 0x165   :  { %v161_v10 = vpop.permute.xlu0 %160 }
 0x166   :  { %2135 = vmatprep.subr.msk.mxu1 %vm164_vm1, %v161_v10 }
 0x167   :  { %2136 = vmatpush3.xpose.msk.msra.mxu1 %vm164_vm1, %v161_v10 }
 0x16a   :  { %2138 = vmatmul.mubr.msk.f32.vlgmr.msra.gmra.mxu1 %vm164_vm1, %v157_v11 }
 0x22a   :  { %v2139_v12 = vpop.f32.mrf.mxu1 }
 0x22b   :  { %v247_v17 = vadd.f32 %v2139_v12, %v2503_v14 }
 0x22c   :  { %v241_v15 = vpop.f32.mrf.mxu1 }
 0x22d   :  { %v242_v16 = vadd.f32 %v241_v15, %v2501_v13  ;;  %v253_v19 = vsel %vm164_vm1, %v247_v17, -inf }
 0x22f   :  { %v250_v18 = vsel %vm164_vm1, %v242_v16, -inf }
 0x230   :  { %251 = vmax.xlane.f32.xlu1 %v250_v18 }
 0x234   :  { %254 = vmax.xlane.f32.xlu1 %v253_v19 }
 0x2b9   :  { %v252_v20 = vpop.xlane.xlu1 %251 }
 0x2ba   :  { %v256_v21 = vsub.f32 %v242_v16, %v252_v20 }
 0x2bc   :  { %v258_v22 = vmul.f32 1.442695, %v256_v21 }
 0x2bd   :  { %v255_v23 = vpop.xlane.xlu1 %254 }
 0x2be   :  { %2294 = vpow2.f32 %v258_v22  ;;  %v257_v24 = vsub.f32 %v247_v17, %v255_v23 }
 0x2c0   :  { %v260_v25 = vmul.f32 1.442695, %v257_v24 }
 0x2c2   :  { %2296 = vpow2.f32 %v260_v25 }
 0x2cb   :  { %v2295_v26 = vpop.eup %2294 }
 0x2cc   :  { %v262_v27 = vsel %vm164_vm1, %v2295_v26, 0.0 }
 0x2cd   :  { %263 = vadd.xlane.f32.xlu0 %v262_v27 }
 0x2cf   :  { %v2297_v28 = vpop.eup %2296 }
 0x2d0   :  { %v265_v29 = vsel %vm164_vm1, %v2297_v28, 0.0 }
 0x2d1   :  { %266 = vadd.xlane.f32.xlu1 %v265_v29  ;;  %v66_v29 = vld [vmem:[#allocation5 + $0x50] sm:$0xff] }
 0x2e2   :  { %274 = vrot.lane.b32.xlu1 %v2485_v6, %s2434_s2 }
 0x2e3   :  { %361 = vrot.lane.b32.xlu0 %v156_v8, %s2435_s28 }
 0x2e6   :  { %272 = vrot.lane.b32.xlu1 %v2489_v7, %s2434_s2 }
 0x2ea   :  { %367 = vrot.lane.b32.xlu1 %v2485_v6, %s2436_s29 }
 0x2ee   :  { %365 = vrot.lane.b32.xlu1 %v2489_v7, %s2436_s29 }
 0x2f2   :  { %363 = vrot.lane.b32.xlu1 %v157_v11, %s2435_s28 }
 0x356   :  { %v264_v30 = vpop.xlane.xlu0 %263 }
 0x357   :  { %2298 = vrcp.f32 %v264_v30  ;;  %v71_v30 = vld [vmem:[#allocation5 + $0x78] sm:$0xff] }
 0x35a   :  { %v267_v31 = vpop.xlane.xlu1 %266  ;;  %v362_v40 = vpop.permute.xlu0 %361 }
 0x35b   :  { %2300 = vrcp.f32 %v267_v31 }
 0x35e   :  { %v275_v32 = vpop.permute.xlu1 %274 }
 0x35f   :  { %2140 = vmatprep.subr.mxu1 %v275_v32 }
 0x360   :  { %2141 = vmatpush3.msra.mxu1 %v275_v32 }
 0x362   :  { %v273_v33 = vpop.permute.xlu1 %272 }
 0x363   :  { %2142 = vmatprep.subr.mxu1 %v273_v33 }
 0x364   :  { %v2299_v34 = vpop.eup %2298  ;;  %2143 = vmatpush3.msra.mxu1 %v273_v33 }
 0x365   :  { %v270_v35 = vmul.f32 %v2299_v34, %v2295_v26 }
 0x366   :  { %v368_v36 = vpop.permute.xlu1 %367 }
 0x367   :  { %2144 = vmatprep.mubr.msk.f32.mxu1 %vm164_vm1, %v270_v35  ;;  %2147 = vmatprep.subr.msk.mxu1 %vm164_vm1, %v368_v36 }
 0x368   :  { %v2301_v37 = vpop.eup %2300 }
 0x369   :  { %v271_v38 = vmul.f32 %v2301_v37, %v2297_v28  ;;  %v67_v28 = vld [vmem:[#allocation5 + $0x58] sm:$0xff] }
 0x36a   :  { %v366_v39 = vpop.permute.xlu1 %365 }
 0x36b   :  { %2145 = vmatmul.mubr.msk.f32.vlgmr.msra.gmra.mxu1 %vm164_vm1, %v271_v38 }
 0x36c   :  { %2148 = vmatpush3.xpose.msk.msra.mxu1 %vm164_vm1, %v368_v36  ;;  %2151 = vmatprep.mubr.msk.f32.mxu1 %vm164_vm1, %v362_v40 }
 0x36d   :  { %2149 = vmatprep.subr.msk.mxu1 %vm164_vm1, %v366_v39 }
 0x36e   :  { %v364_v41 = vpop.permute.xlu1 %363 }
 0x370   :  { %2150 = vmatpush3.xpose.msk.msra.mxu1 %vm164_vm1, %v366_v39 }
 0x371   :  { %2168 = vmatprep.subr.mxu1 %v360_v42 }
 0x373   :  { %2152 = vmatmul.mubr.msk.f32.vlgmr.msra.gmra.mxu1 %vm164_vm1, %v364_v41 }
 0x374   :  { %2169 = vmatpush3.msra.mxu1 %v360_v42 }
 0x375   :  { %2170 = vmatprep.subr.mxu1 %v359_v43 }
 0x376   :  { %2171 = vmatpush3.msra.mxu1 %v359_v43 }
 0x377   :  { %2186 = vmatprep.subr.mxu1 %v71_v30 }
 0x42b   :  { %v2146_v44 = vpop.f32.mrf.mxu1 }
 0x42d   :  { %v350_v45 = vpop.f32.mrf.mxu1 }
 0x42e   :  { %2172 = vmatprep.mubr.msk.f32.mxu1 %vm164_vm1, %v350_v45 }
 0x42f   :  { %2173 = vmatmul.mubr.msk.f32.vlgmr.msra.gmra.mxu1 %vm164_vm1, %v2146_v44 }
 0x430   :  { %2187 = vmatpush3.msra.mxu1 %v71_v30 }
 0x433   :  { %v2153_v46 = vpop.f32.mrf.mxu1 }
 0x434   :  { %v449_v47 = vadd.f32 %v2153_v46, %v2503_v14 }
 0x435   :  { %v443_v48 = vpop.f32.mrf.mxu1 }
 0x436   :  { %v444_v49 = vadd.f32 %v443_v48, %v2501_v13  ;;  %v455_v50 = vsel %vm164_vm1, %v449_v47, -inf }
 0x437   :  { %456 = vmax.xlane.f32.xlu0 %v455_v50 }
 0x438   :  { %v452_v51 = vsel %vm164_vm1, %v444_v49, -inf }
 0x439   :  { %453 = vmax.xlane.f32.xlu1 %v452_v51 }
 0x44d   :  { %474 = vrot.lane.b32.xlu0 %v2489_v7, %s2437_s30 }
 0x4c0   :  { %v457_v52 = vpop.xlane.xlu0 %456 }
 0x4c1   :  { %v459_v53 = vsub.f32 %v449_v47, %v457_v52  ;;  %v2000_v52 = vld [vmem:[#allocation5 + $0x80] ss:$0 sm:$0xff] }
 0x4c2   :  { %v454_v54 = vpop.xlane.xlu1 %453 }
 0x4c3   :  { %v462_v55 = vmul.f32 1.442695, %v459_v53  ;;  %v458_v56 = vsub.f32 %v444_v49, %v454_v54 }
 0x4c4   :  { %v475_v1 = vpop.permute.xlu0 %474 }
 0x4c5   :  { %2302 = vpow2.f32 %v462_v55  ;;  %v460_v57 = vmul.f32 1.442695, %v458_v56  ;;  %v70_v56 = vld [vmem:[#allocation5 + $0x70] sm:$0xff] }
 0x4c6   :  { %2188 = vmatprep.subr.mxu1 %v70_v56 }
 0x4c7   :  { %2304 = vpow2.f32 %v460_v57  ;;  %2189 = vmatpush3.msra.mxu1 %v70_v56  ;;  %v69_v57 = vld [vmem:[#allocation5 + $0x68] sm:$0xff] }
 0x4c8   :  { %2190 = vmatprep.subr.mxu1 %v69_v57 }
 0x4c9   :  { %2191 = vmatpush3.msra.mxu1 %v69_v57 }
 0x4d2   :  { %v2303_v58 = vpop.eup %2302 }
 0x4d3   :  { %v467_v59 = vsel %vm164_vm1, %v2303_v58, 0.0 }
 0x4d4   :  { %v2305_v60 = vpop.eup %2304  ;;  %468 = vadd.xlane.f32.xlu1 %v467_v59 }
 0x4d5   :  { %v464_v61 = vsel %vm164_vm1, %v2305_v60, 0.0 }
 0x4d8   :  { %465 = vadd.xlane.f32.xlu1 %v464_v61 }
 0x4e9   :  { %476 = vrot.lane.b32.xlu1 %v2485_v6, %s2437_s30  ;;  %v561_v6 = vld [vmem:[#allocation5 + $0x30] sm:$0xff] }
 0x4ef   :  { %v2174_v12 = vpop.f32.mrf.mxu1 }
 0x4f1   :  { %v716_v17 = vpop.f32.mrf.mxu1 }
 0x55d   :  { %v469_v62 = vpop.xlane.xlu1 %468 }
 0x55e   :  { %2306 = vrcp.f32 %v469_v62 }
 0x561   :  { %v466_v63 = vpop.xlane.xlu1 %465 }
 0x562   :  { %2308 = vrcp.f32 %v466_v63 }
 0x565   :  { %v477_v0 = vpop.permute.xlu1 %476 }
 0x566   :  { %2154 = vmatprep.subr.mxu0 %v477_v0 }
 0x567   :  { %2155 = vmatpush3.msra.mxu0 %v477_v0 }
 0x568   :  { %2156 = vmatprep.subr.mxu0 %v475_v1 }
 0x569   :  { %2157 = vmatpush3.msra.mxu0 %v475_v1 }
 0x56a   :  { %2161 = vmatprep.subr.mxu0 %v562_v3 }
 0x56b   :  { %v2307_v4 = vpop.eup %2306 }
 0x56c   :  { %v473_v9 = vmul.f32 %v2307_v4, %v2303_v58  ;;  %v68_v58 = vld [vmem:[#allocation5 + $0x60] sm:$0xff] }
 0x56d   :  { %2192 = vmatprep.subr.mxu1 %v68_v58 }
 0x56e   :  { %2193 = vmatpush3.msra.mxu1 %v68_v58 }
 0x56f   :  { %v2309_v7 = vpop.eup %2308 }
 0x570   :  { %v472_v8 = vmul.f32 %v2309_v7, %v2305_v60 }
 0x572   :  { %2158 = vmatprep.mubr.msk.f32.mxu0 %vm164_vm1, %v472_v8 }
 0x573   :  { %2159 = vmatmul.mubr.msk.f32.vlgmr.msra.gmra.mxu0 %vm164_vm1, %v473_v9 }
 0x574   :  { %2162 = vmatpush3.msra.mxu0 %v562_v3 }
 0x575   :  { %2163 = vmatprep.subr.mxu0 %v561_v6 }
 0x576   :  { %2164 = vmatpush3.msra.mxu0 %v561_v6 }
 0x577   :  { %2175 = vmatprep.subr.mxu0 %v67_v28 }
 0x633   :  { %v2160_v10 = vpop.f32.mrf.mxu0 }
 0x635   :  { %v552_v11 = vpop.f32.mrf.mxu0 }
 0x636   :  { %2165 = vmatprep.mubr.msk.f32.mxu0 %vm164_vm1, %v552_v11  ;;  %v973_v11 = vld [vmem:[#allocation5 + $0xa8] sm:$0xff] }
 0x637   :  { %2166 = vmatmul.mubr.msk.f32.vlgmr.msra.gmra.mxu0 %vm164_vm1, %v2160_v10 }
 0x638   :  { %2176 = vmatpush3.msra.mxu0 %v67_v28 }
 0x639   :  { %2177 = vmatprep.subr.mxu0 %v66_v29 }
 0x63a   :  { %2178 = vmatpush3.msra.mxu0 %v66_v29 }
 0x6f7   :  { %v2167_v15 = vpop.f32.mrf.mxu0 }
 0x6f8   :  { %v722_v16 = vadd.f32 %v2174_v12, %v2167_v15  ;;  %v972_v12 = vld [vmem:[#allocation5 + $0xa0] sm:$0xff]  ;;  %v971_v15 = vld [vmem:[#allocation5 + $0x98] sm:$0xff] }
 0x6f9   :  { %v635_v18 = vpop.f32.mrf.mxu0 }
 0x6fa   :  { %v726_v19 = vadd.f32 %v722_v16, %v2481_v5  ;;  %v717_v20 = vadd.f32 %v716_v17, %v635_v18  ;;  %v65_v5 = vld [vmem:[#allocation5 + $0x48] sm:$0xff]  ;;  %v970_v16 = vld [vmem:[#allocation5 + $0x90] sm:$0xff] }
 0x6fb   :  { %2179 = vmatprep.subr.mxu0 %v65_v5 }
 0x6fc   :  { %v725_v21 = vadd.f32 %v717_v20, %v2477_v2  ;;  %v730_v22 = vsel %vm74_vm0, %v726_v19, 0.0  ;;  %v737_v23 = vmul.f32 %v726_v19, %v726_v19  ;;  %v64_v2 = vld [vmem:[#allocation5 + $0x40] sm:$0xff]  ;;  %2180 = vmatpush3.msra.mxu0 %v65_v5 }
 0x6fd   :  { %731 = vadd.xlane.f32.xlu0 %v730_v22  ;;  %2181 = vmatprep.subr.mxu0 %v64_v2 }
 0x6fe   :  { %v727_v24 = vsel %vm74_vm0, %v725_v21, 0.0  ;;  %v736_v25 = vmul.f32 %v725_v21, %v725_v21  ;;  %v741_v26 = vsel %vm74_vm0, %v737_v23, 0.0  ;;  %2182 = vmatpush3.msra.mxu0 %v64_v2 }
 0x6ff   :  { %728 = vadd.xlane.f32.xlu1 %v727_v24  ;;  %2197 = vmatprep.subr.mxu0 %v973_v11 }
 0x700   :  { %v738_v27 = vsel %vm74_vm0, %v736_v25, 0.0 }
 0x701   :  { %742 = vadd.xlane.f32.xlu0 %v741_v26 }
 0x703   :  { %739 = vadd.xlane.f32.xlu1 %v738_v27 }
 0x786   :  { %v732_v31 = vpop.xlane.xlu0 %731 }
 0x787   :  { %v735_v32 = vmul.f32 0.03125, %v732_v31 }
 0x788   :  { %v729_v33 = vpop.xlane.xlu1 %728 }
 0x789   :  { %v734_v34 = vmul.f32 0.03125, %v729_v33  ;;  %v747_v36 = vmul.f32 %v735_v32, %v735_v32  ;;  %v753_v48 = vsub.f32 %v726_v19, %v735_v32 }
 0x78a   :  { %v743_v35 = vpop.xlane.xlu0 %742 }
 0x78b   :  { %v745_v37 = vmul.f32 0.03125, %v743_v35  ;;  %v746_v39 = vmul.f32 %v734_v34, %v734_v34  ;;  %v752_v49 = vsub.f32 %v725_v21, %v734_v34 }
 0x78c   :  { %v740_v38 = vpop.xlane.xlu1 %739 }
 0x78d   :  { %v749_v40 = vsub.f32 %v745_v37, %v747_v36  ;;  %v744_v41 = vmul.f32 0.03125, %v740_v38  ;;  %v2005_v36 = vld [vmem:[#allocation5 + $0x88] ss:$0 sm:$0xff] }
 0x78f   :  { %v751_v42 = vmax.f32 %v749_v40, 0.0  ;;  %v748_v43 = vsub.f32 %v744_v41, %v746_v39 }
 0x791   :  { %v755_v44 = vadd.f32 1e-05, %v751_v42  ;;  %v750_v45 = vmax.f32 %v748_v43, 0.0 }
 0x793   :  { %2310 = vrsqrt.f32 %v755_v44  ;;  %v754_v46 = vadd.f32 1e-05, %v750_v45 }
 0x795   :  { %2312 = vrsqrt.f32 %v754_v46 }
 0x7a0   :  { %v2311_v47 = vpop.eup %2310 }
 0x7a1   :  { %v759_v51 = vmul.f32 %v2311_v47, %v753_v48 }
 0x7a2   :  { %v2313_v50 = vpop.eup %2312 }
 0x7a3   :  { %v758_v53 = vmul.f32 %v2313_v50, %v752_v49  ;;  %v765_v55 = vmul.f32 %v2000_v52, %v759_v51 }
 0x7a5   :  { %v764_v54 = vmul.f32 %v2000_v52, %v758_v53 }
 0x7a7   :  { %2183 = vmatprep.mubr.msk.f32.mxu0 %vm74_vm0, %v764_v54 }
 0x7a8   :  { %2184 = vmatmul.mubr.msk.f32.vlgmr.msra.gmra.mxu0 %vm74_vm0, %v765_v55 }
 0x7a9   :  { %2198 = vmatpush3.msra.mxu0 %v973_v11 }
 0x7aa   :  { %2199 = vmatprep.subr.mxu0 %v972_v12 }
 0x7ab   :  { %2200 = vmatpush3.msra.mxu0 %v972_v12 }
 0x7ac   :  { %2201 = vmatprep.subr.mxu0 %v971_v15 }
 0x7ad   :  { %2202 = vmatpush3.msra.mxu0 %v971_v15 }
 0x7ae   :  { %2203 = vmatprep.subr.mxu0 %v970_v16 }
 0x7af   :  { %2204 = vmatpush3.msra.mxu0 %v970_v16 }
 0x868   :  { %v2185_v59 = vpop.f32.mrf.mxu0 }
 0x869   :  { %v848_v62 = vmax.f32 %v2185_v59, 0.0 }
 0x86a   :  { %v838_v60 = vpop.f32.mrf.mxu0 }
 0x86b   :  { %v847_v61 = vmax.f32 %v838_v60, 0.0 }
 0x86d   :  { %2194 = vmatprep.mubr.msk.f32.mxu1 %vm74_vm0, %v847_v61 }
 0x86e   :  { %2195 = vmatmul.mubr.msk.f32.vlgmr.msra.gmra.mxu1 %vm74_vm0, %v848_v62 }
 0x92e   :  { %v2196_v63 = vpop.f32.mrf.mxu1 }
 0x92f   :  { %v931_v0 = vadd.f32 %v2196_v63, %v765_v55 }
 0x930   :  { %v921_v1 = vpop.f32.mrf.mxu1 }
 0x931   :  { %v930_v3 = vadd.f32 %v921_v1, %v764_v54  ;;  %v935_v4 = vsel %vm74_vm0, %v931_v0, 0.0  ;;  %v941_v7 = vmul.f32 %v931_v0, %v931_v0 }
 0x932   :  { %936 = vadd.xlane.f32.xlu0 %v935_v4 }
 0x933   :  { %v932_v8 = vsel %vm74_vm0, %v930_v3, 0.0  ;;  %v940_v9 = vmul.f32 %v930_v3, %v930_v3  ;;  %v945_v6 = vsel %vm74_vm0, %v941_v7, 0.0 }
 0x934   :  { %933 = vadd.xlane.f32.xlu1 %v932_v8 }
 0x935   :  { %v942_v10 = vsel %vm74_vm0, %v940_v9, 0.0 }
 0x936   :  { %946 = vadd.xlane.f32.xlu0 %v945_v6 }
 0x938   :  { %943 = vadd.xlane.f32.xlu1 %v942_v10 }
 0x9bb   :  { %v937_v17 = vpop.xlane.xlu0 %936 }
 0x9bc   :  { %v939_v18 = vmul.f32 0.03125, %v937_v17 }
 0x9bd   :  { %v934_v19 = vpop.xlane.xlu1 %933 }
 0x9be   :  { %v938_v20 = vmul.f32 0.03125, %v934_v19  ;;  %v951_v22 = vmul.f32 %v939_v18, %v939_v18  ;;  %v957_v32 = vsub.f32 %v931_v0, %v939_v18 }
 0x9bf   :  { %v947_v21 = vpop.xlane.xlu0 %946 }
 0x9c0   :  { %v949_v23 = vmul.f32 0.03125, %v947_v21  ;;  %v950_v25 = vmul.f32 %v938_v20, %v938_v20  ;;  %v956_v33 = vsub.f32 %v930_v3, %v938_v20 }
 0x9c1   :  { %v944_v24 = vpop.xlane.xlu1 %943 }
 0x9c2   :  { %v953_v26 = vsub.f32 %v949_v23, %v951_v22  ;;  %v948_v27 = vmul.f32 0.03125, %v944_v24 }
 0x9c4   :  { %v955_v28 = vmax.f32 %v953_v26, 0.0  ;;  %v952_v29 = vsub.f32 %v948_v27, %v950_v25 }
 0x9c6   :  { %v959_v5 = vadd.f32 1e-05, %v955_v28  ;;  %v954_v2 = vmax.f32 %v952_v29, 0.0 }
 0x9c8   :  { %2314 = vrsqrt.f32 %v959_v5  ;;  %v958_v30 = vadd.f32 1e-05, %v954_v2 }
 0x9ca   :  { %2316 = vrsqrt.f32 %v958_v30 }
 0x9d5   :  { %v2315_v31 = vpop.eup %2314 }
 0x9d6   :  { %v963_v35 = vmul.f32 %v2315_v31, %v957_v32 }
 0x9d7   :  { %v2317_v34 = vpop.eup %2316 }
 0x9d8   :  { %v962_v37 = vmul.f32 %v2317_v34, %v956_v33  ;;  %v2561_v39 = vmul.f32 %v2005_v36, %v963_v35  ;;  %v1268_v34 = vld [vmem:[#allocation5 + $0xb8] sm:$0xff]  ;;  %v1267_v35 = vld [vmem:[#allocation5 + $0xb0] sm:$0xff] }
 0x9da   :  { %v2559_v38 = vmul.f32 %v2005_v36, %v962_v37  ;;  %v1470_v36 = vld [vmem:[#allocation5 + $0xc8] sm:$0xff]  ;;  %v1469_v37 = vld [vmem:[#allocation5 + $0xc0] sm:$0xff] }
 0x9dc   :  { %2205 = vmatprep.mubr.msk.f32.mxu0 %vm74_vm0, %v2559_v38 }
 0x9dd   :  { %2206 = vmatmul.mubr.msk.f32.vlgmr.msra.gmra.mxu0 %vm74_vm0, %v2561_v39 }
 0xa9d   :  { %v2567_v40 = vpop.f32.mrf.mxu0 }
 0xa9e   :  { %1071 = vrot.lane.b32.xlu1 %v2567_v40, %s2433_s0  ;;  %v1066_v43 = vmul.f32 0.25, %v2567_v40 }
 0xa9f   :  { %v2571_v41 = vpop.f32.mrf.mxu0 }
 0xaa0   :  { %1069 = vrot.lane.b32.xlu0 %v2571_v41, %s2433_s0  ;;  %v1065_v42 = vmul.f32 0.25, %v2571_v41 }
 0xaa2   :  { %1275 = vrot.lane.b32.xlu1 %v2567_v40, %s2436_s29  ;;  %2212 = vmatprep.mubr.msk.f32.mxu1 %vm164_vm1, %v1065_v42 }
 0xaa4   :  { %1269 = vrot.lane.b32.xlu0 %v1065_v42, %s2435_s28 }
 0xaa6   :  { %1273 = vrot.lane.b32.xlu1 %v2571_v41, %s2436_s29 }
 0xaaa   :  { %1271 = vrot.lane.b32.xlu1 %v1066_v43, %s2435_s28 }
 0xb10   :  { %v1072_v44 = vpop.permute.xlu1 %1071 }
 0xb11   :  { %2208 = vmatprep.subr.msk.mxu1 %vm164_vm1, %v1072_v44 }
 0xb12   :  { %2209 = vmatpush3.xpose.msk.msra.mxu1 %vm164_vm1, %v1072_v44  ;;  %v1070_v45 = vpop.permute.xlu0 %1069 }
 0xb13   :  { %2210 = vmatprep.subr.msk.mxu1 %vm164_vm1, %v1070_v45 }
 0xb14   :  { %v1276_v46 = vpop.permute.xlu1 %1275 }
 0xb16   :  { %2211 = vmatpush3.xpose.msk.msra.mxu1 %vm164_vm1, %v1070_v45  ;;  %v1270_v47 = vpop.permute.xlu0 %1269 }
 0xb17   :  { %2222 = vmatprep.subr.msk.mxu1 %vm164_vm1, %v1276_v46 }
 0xb18   :  { %v1274_v48 = vpop.permute.xlu1 %1273 }
 0xb19   :  { %2213 = vmatmul.mubr.msk.f32.vlgmr.msra.gmra.mxu1 %vm164_vm1, %v1066_v43 }
 0xb1a   :  { %2223 = vmatpush3.xpose.msk.msra.mxu1 %vm164_vm1, %v1276_v46  ;;  %2226 = vmatprep.mubr.msk.f32.mxu1 %vm164_vm1, %v1270_v47 }
 0xb1b   :  { %2224 = vmatprep.subr.msk.mxu1 %vm164_vm1, %v1274_v48 }
 0xb1c   :  { %v1272_v49 = vpop.permute.xlu1 %1271 }
 0xb1e   :  { %2225 = vmatpush3.xpose.msk.msra.mxu1 %vm164_vm1, %v1274_v48 }
 0xb1f   :  { %2243 = vmatprep.subr.mxu1 %v1268_v34 }
 0xb21   :  { %2227 = vmatmul.mubr.msk.f32.vlgmr.msra.gmra.mxu1 %vm164_vm1, %v1272_v49 }
 0xb22   :  { %2244 = vmatpush3.msra.mxu1 %v1268_v34 }
 0xb23   :  { %2245 = vmatprep.subr.mxu1 %v1267_v35 }
 0xb24   :  { %2246 = vmatpush3.msra.mxu1 %v1267_v35 }
 0xbd9   :  { %v2214_v50 = vpop.f32.mrf.mxu1 }
 0xbda   :  { %v1155_v51 = vadd.f32 %v2214_v50, %v2503_v14 }
 0xbdb   :  { %v1149_v52 = vpop.f32.mrf.mxu1 }
 0xbdc   :  { %v1150_v53 = vadd.f32 %v1149_v52, %v2501_v13  ;;  %v1161_v54 = vsel %vm164_vm1, %v1155_v51, -inf }
 0xbdd   :  { %1162 = vmax.xlane.f32.xlu1 %v1161_v54 }
 0xbde   :  { %v1158_v55 = vsel %vm164_vm1, %v1150_v53, -inf }
 0xbdf   :  { %1159 = vmax.xlane.f32.xlu0 %v1158_v55 }
 0xbe1   :  { %v2228_v56 = vpop.f32.mrf.mxu1 }
 0xbe2   :  { %v1357_v59 = vadd.f32 %v2228_v56, %v2503_v14 }
 0xbe3   :  { %v1351_v57 = vpop.f32.mrf.mxu1 }
 0xbe4   :  { %v1352_v58 = vadd.f32 %v1351_v57, %v2501_v13  ;;  %v1363_v61 = vsel %vm164_vm1, %v1357_v59, -inf }
 0xbe6   :  { %v1360_v60 = vsel %vm164_vm1, %v1352_v58, -inf }
 0xbe7   :  { %1361 = vmax.xlane.f32.xlu0 %v1360_v60  ;;  %v981_v60 = vld [vmem:[#allocation5 + $0x108] sm:$0xff] }
 0xbe8   :  { %2261 = vmatprep.subr.mxu1 %v981_v60 }
 0xbeb   :  { %1364 = vmax.xlane.f32.xlu0 %v1363_v61 }
 0xbee   :  { %1182 = vrot.lane.b32.xlu1 %v2567_v40, %s2434_s2 }
 0xc66   :  { %v1163_v62 = vpop.xlane.xlu1 %1162 }
 0xc67   :  { %v1165_v63 = vsub.f32 %v1155_v51, %v1163_v62 }
 0xc68   :  { %v1160_v0 = vpop.xlane.xlu0 %1159 }
 0xc69   :  { %v1168_v1 = vmul.f32 1.442695, %v1165_v63  ;;  %v1164_v3 = vsub.f32 %v1150_v53, %v1160_v0 }
 0xc6a   :  { %v1183_v4 = vpop.permute.xlu1 %1182 }
 0xc6b   :  { %2318 = vpow2.f32 %v1168_v1  ;;  %v1166_v7 = vmul.f32 1.442695, %v1164_v3  ;;  %2215 = vmatprep.subr.mxu0 %v1183_v4 }
 0xc6c   :  { %2216 = vmatpush3.msra.mxu0 %v1183_v4 }
 0xc6d   :  { %2320 = vpow2.f32 %v1166_v7 }
 0xc70   :  { %v1362_v13 = vpop.xlane.xlu0 %1361 }
 0xc71   :  { %v1366_v17 = vsub.f32 %v1352_v58, %v1362_v13  ;;  %v977_v58 = vld [vmem:[#allocation5 + $0xe8] sm:$0xff] }
 0xc73   :  { %v1368_v18 = vmul.f32 1.442695, %v1366_v17  ;;  %v2024_v17 = vld [vmem:[#allocation5 + $0x110] ss:$0 sm:$0xff] }
 0xc74   :  { %v1365_v14 = vpop.xlane.xlu0 %1364 }
 0xc75   :  { %v1367_v8 = vsub.f32 %v1357_v59, %v1365_v14  ;;  %v976_v59 = vld [vmem:[#allocation5 + $0xe0] sm:$0xff] }
 0xc77   :  { %v1370_v9 = vmul.f32 1.442695, %v1367_v8 }
 0xc78   :  { %v2319_v6 = vpop.eup %2318 }
 0xc79   :  { %2322 = vpow2.f32 %v1370_v9  ;;  %v1173_v10 = vsel %vm164_vm1, %v2319_v6, 0.0 }
 0xc7a   :  { %v2321_v11 = vpop.eup %2320  ;;  %1174 = vadd.xlane.f32.xlu0 %v1173_v10  ;;  %2324 = vpow2.f32 %v1368_v18 }
 0xc7b   :  { %v1170_v12 = vsel %vm164_vm1, %v2321_v11, 0.0 }
 0xc7c   :  { %1171 = vadd.xlane.f32.xlu1 %v1170_v12 }
 0xc86   :  { %v2323_v15 = vpop.eup %2322 }
 0xc87   :  { %v1375_v16 = vsel %vm164_vm1, %v2323_v15, 0.0  ;;  %v2325_v19 = vpop.eup %2324 }
 0xc88   :  { %1376 = vadd.xlane.f32.xlu0 %v1375_v16  ;;  %v1372_v20 = vsel %vm164_vm1, %v2325_v19, 0.0 }
 0xc8d   :  { %1384 = vrot.lane.b32.xlu1 %v2567_v40, %s2437_s30 }
 0xc9e   :  { %1180 = vrot.lane.b32.xlu0 %v2571_v41, %s2434_s2 }
 0xcb1   :  { %1373 = vadd.xlane.f32.xlu1 %v1372_v20 }
 0xcc2   :  { %1382 = vrot.lane.b32.xlu1 %v2571_v41, %s2437_s30 }
 0xd03   :  { %v1175_v21 = vpop.xlane.xlu0 %1174 }
 0xd04   :  { %2326 = vrcp.f32 %v1175_v21 }
 0xd05   :  { %v1172_v22 = vpop.xlane.xlu1 %1171 }
 0xd06   :  { %2328 = vrcp.f32 %v1172_v22 }
 0xd09   :  { %v1385_v29 = vpop.permute.xlu1 %1384 }
 0xd11   :  { %v1377_v23 = vpop.xlane.xlu0 %1376  ;;  %v2327_v24 = vpop.eup %2326 }
 0xd12   :  { %v1179_v28 = vmul.f32 %v2327_v24, %v2319_v6  ;;  %2330 = vrcp.f32 %v1377_v23  ;;  %v980_v24 = vld [vmem:[#allocation5 + $0x100] sm:$0xff] }
 0xd13   :  { %v2329_v25 = vpop.eup %2328 }
 0xd14   :  { %v1178_v26 = vmul.f32 %v2329_v25, %v2321_v11  ;;  %v979_v25 = vld [vmem:[#allocation5 + $0xf8] sm:$0xff] }
 0xd15   :  { %v1181_v27 = vpop.permute.xlu0 %1180 }
 0xd16   :  { %2217 = vmatprep.subr.mxu0 %v1181_v27  ;;  %2219 = vmatprep.mubr.msk.f32.mxu0 %vm164_vm1, %v1178_v26  ;;  %v978_v26 = vld [vmem:[#allocation5 + $0xf0] sm:$0xff] }
 0xd17   :  { %2218 = vmatpush3.msra.mxu0 %v1181_v27 }
 0xd18   :  { %2220 = vmatmul.mubr.msk.f32.vlgmr.msra.gmra.mxu0 %vm164_vm1, %v1179_v28  ;;  %2229 = vmatprep.subr.mxu0 %v1385_v29 }
 0xd19   :  { %2230 = vmatpush3.msra.mxu0 %v1385_v29 }
 0xd1f   :  { %v2331_v30 = vpop.eup %2330 }
 0xd20   :  { %v1381_v33 = vmul.f32 %v2331_v30, %v2323_v15 }
 0xd3a   :  { %v1374_v5 = vpop.xlane.xlu1 %1373 }
 0xd3b   :  { %2332 = vrcp.f32 %v1374_v5 }
 0xd3e   :  { %v1383_v2 = vpop.permute.xlu1 %1382 }
 0xd3f   :  { %2231 = vmatprep.subr.mxu0 %v1383_v2 }
 0xd40   :  { %2232 = vmatpush3.msra.mxu0 %v1383_v2 }
 0xd41   :  { %2236 = vmatprep.subr.mxu0 %v1470_v36 }
 0xd48   :  { %v2333_v31 = vpop.eup %2332 }
 0xd49   :  { %v1380_v32 = vmul.f32 %v2333_v31, %v2325_v19 }
 0xd4b   :  { %2233 = vmatprep.mubr.msk.f32.mxu0 %vm164_vm1, %v1380_v32 }
 0xd4c   :  { %2234 = vmatmul.mubr.msk.f32.vlgmr.msra.gmra.mxu0 %vm164_vm1, %v1381_v33 }
 0xd4d   :  { %2237 = vmatpush3.msra.mxu0 %v1470_v36 }
 0xd4e   :  { %2238 = vmatprep.subr.mxu0 %v1469_v37 }
 0xd4f   :  { %2239 = vmatpush3.msra.mxu0 %v1469_v37 }
 0xd50   :  { %2250 = vmatprep.subr.mxu0 %v977_v58 }
 0xdd8   :  { %v2221_v40 = vpop.f32.mrf.mxu0 }
 0xdda   :  { %v1258_v41 = vpop.f32.mrf.mxu0 }
 0xddb   :  { %2247 = vmatprep.mubr.msk.f32.mxu1 %vm164_vm1, %v1258_v41  ;;  %v1880_v41 = vld [vmem:[#allocation5 + $0x138] sm:$0xff] }
 0xddc   :  { %2248 = vmatmul.mubr.msk.f32.vlgmr.msra.gmra.mxu1 %vm164_vm1, %v2221_v40 }
 0xddd   :  { %2262 = vmatpush3.msra.mxu1 %v981_v60 }
 0xdde   :  { %2263 = vmatprep.subr.mxu1 %v980_v24 }
 0xddf   :  { %2264 = vmatpush3.msra.mxu1 %v980_v24 }
 0xde0   :  { %2265 = vmatprep.subr.mxu1 %v979_v25 }
 0xde1   :  { %2266 = vmatpush3.msra.mxu1 %v979_v25 }
 0xde2   :  { %2267 = vmatprep.subr.mxu1 %v978_v26 }
 0xde3   :  { %2268 = vmatpush3.msra.mxu1 %v978_v26 }
 0xe0c   :  { %v2235_v42 = vpop.f32.mrf.mxu0 }
 0xe0e   :  { %v1460_v43 = vpop.f32.mrf.mxu0 }
 0xe0f   :  { %2240 = vmatprep.mubr.msk.f32.mxu0 %vm164_vm1, %v1460_v43  ;;  %v1878_v43 = vld [vmem:[#allocation5 + $0x128] sm:$0xff] }
 0xe10   :  { %2241 = vmatmul.mubr.msk.f32.vlgmr.msra.gmra.mxu0 %vm164_vm1, %v2235_v42  ;;  %v1879_v42 = vld [vmem:[#allocation5 + $0x130] sm:$0xff] }
 0xe11   :  { %2251 = vmatpush3.msra.mxu0 %v977_v58 }
 0xe12   :  { %2252 = vmatprep.subr.mxu0 %v976_v59 }
 0xe13   :  { %2253 = vmatpush3.msra.mxu0 %v976_v59 }
 0xe9c   :  { %v2249_v44 = vpop.f32.mrf.mxu1 }
 0xe9e   :  { %v1624_v47 = vpop.f32.mrf.mxu1 }
 0xed0   :  { %v2242_v45 = vpop.f32.mrf.mxu0 }
 0xed1   :  { %v1630_v46 = vadd.f32 %v2249_v44, %v2242_v45  ;;  %v1877_v44 = vld [vmem:[#allocation5 + $0x120] sm:$0xff] }
 0xed2   :  { %v1543_v48 = vpop.f32.mrf.mxu0 }
 0xed3   :  { %v1634_v49 = vadd.f32 %v1630_v46, %v2561_v39  ;;  %v1625_v50 = vadd.f32 %v1624_v47, %v1543_v48  ;;  %v975_v39 = vld [vmem:[#allocation5 + $0xd8] sm:$0xff] }
 0xed4   :  { %2254 = vmatprep.subr.mxu0 %v975_v39 }
 0xed5   :  { %v1633_v51 = vadd.f32 %v1625_v50, %v2559_v38  ;;  %v1638_v52 = vsel %vm74_vm0, %v1634_v49, 0.0  ;;  %v1644_v56 = vmul.f32 %v1634_v49, %v1634_v49  ;;  %2255 = vmatpush3.msra.mxu0 %v975_v39  ;;  %v974_v38 = vld [vmem:[#allocation5 + $0xd0] sm:$0xff] }
 0xed6   :  { %1639 = vadd.xlane.f32.xlu1 %v1638_v52  ;;  %2256 = vmatprep.subr.mxu0 %v974_v38 }
 0xed7   :  { %v1635_v53 = vsel %vm74_vm0, %v1633_v51, 0.0  ;;  %v1643_v54 = vmul.f32 %v1633_v51, %v1633_v51  ;;  %v1648_v57 = vsel %vm74_vm0, %v1644_v56, 0.0  ;;  %2257 = vmatpush3.msra.mxu0 %v974_v38 }
 0xed8   :  { %1636 = vadd.xlane.f32.xlu0 %v1635_v53  ;;  %2272 = vmatprep.subr.mxu0 %v1880_v41 }
 0xed9   :  { %v1645_v55 = vsel %vm74_vm0, %v1643_v54, 0.0 }
 0xedc   :  { %1646 = vadd.xlane.f32.xlu0 %v1645_v55 }
 0xee0   :  { %1649 = vadd.xlane.f32.xlu0 %v1648_v57 }
 0xf5f   :  { %v1640_v63 = vpop.xlane.xlu1 %1639 }
 0xf60   :  { %v1642_v1 = vmul.f32 0.03125, %v1640_v63 }
 0xf61   :  { %v1637_v61 = vpop.xlane.xlu0 %1636 }
 0xf62   :  { %v1641_v62 = vmul.f32 0.03125, %v1637_v61  ;;  %v1654_v14 = vmul.f32 %v1642_v1, %v1642_v1  ;;  %v1660_v19 = vsub.f32 %v1634_v49, %v1642_v1 }
 0xf64   :  { %v1653_v3 = vmul.f32 %v1641_v62, %v1641_v62  ;;  %v1659_v15 = vsub.f32 %v1633_v51, %v1641_v62 }
 0xf65   :  { %v1647_v0 = vpop.xlane.xlu0 %1646 }
 0xf66   :  { %v1651_v4 = vmul.f32 0.03125, %v1647_v0  ;;  %v2029_v0 = vld [vmem:[#allocation5 + $0x118] ss:$0 sm:$0xff] }
 0xf68   :  { %v1655_v7 = vsub.f32 %v1651_v4, %v1653_v3 }
 0xf69   :  { %v1650_v13 = vpop.xlane.xlu0 %1649 }
 0xf6a   :  { %v1657_v8 = vmax.f32 %v1655_v7, 0.0  ;;  %v1652_v9 = vmul.f32 0.03125, %v1650_v13 }
 0xf6c   :  { %v1661_v6 = vadd.f32 1e-05, %v1657_v8  ;;  %v1656_v10 = vsub.f32 %v1652_v9, %v1654_v14 }
 0xf6e   :  { %2334 = vrsqrt.f32 %v1661_v6  ;;  %v1658_v11 = vmax.f32 %v1656_v10, 0.0 }
 0xf70   :  { %v1662_v12 = vadd.f32 1e-05, %v1658_v11 }
 0xf72   :  { %2336 = vrsqrt.f32 %v1662_v12 }
 0xf7b   :  { %v2335_v16 = vpop.eup %2334 }
 0xf7c   :  { %v1665_v18 = vmul.f32 %v2335_v16, %v1659_v15 }
 0xf7e   :  { %v1671_v20 = vmul.f32 %v2024_v17, %v1665_v18 }
 0xf7f   :  { %v2337_v21 = vpop.eup %2336 }
 0xf80   :  { %v1666_v22 = vmul.f32 %v2337_v21, %v1660_v19  ;;  %2258 = vmatprep.mubr.msk.f32.mxu0 %vm74_vm0, %v1671_v20 }
 0xf82   :  { %v1672_v23 = vmul.f32 %v2024_v17, %v1666_v22 }
 0xf84   :  { %2259 = vmatmul.mubr.msk.f32.vlgmr.msra.gmra.mxu0 %vm74_vm0, %v1672_v23 }
 0xf85   :  { %2273 = vmatpush3.msra.mxu0 %v1880_v41 }
 0xf86   :  { %2274 = vmatprep.subr.mxu0 %v1879_v42 }
 0xf87   :  { %2275 = vmatpush3.msra.mxu0 %v1879_v42 }
 0xf88   :  { %2276 = vmatprep.subr.mxu0 %v1878_v43 }
 0xf89   :  { %2277 = vmatpush3.msra.mxu0 %v1878_v43 }
 0xf8a   :  { %2278 = vmatprep.subr.mxu0 %v1877_v44 }
 0xf8b   :  { %2279 = vmatpush3.msra.mxu0 %v1877_v44 }
0x1044   :  { %v2260_v27 = vpop.f32.mrf.mxu0 }
0x1045   :  { %v1755_v5 = vmax.f32 %v2260_v27, 0.0 }
0x1046   :  { %v1745_v28 = vpop.f32.mrf.mxu0 }
0x1047   :  { %v1754_v29 = vmax.f32 %v1745_v28, 0.0 }
0x1049   :  { %2269 = vmatprep.mubr.msk.f32.mxu1 %vm74_vm0, %v1754_v29 }
0x104a   :  { %2270 = vmatmul.mubr.msk.f32.vlgmr.msra.gmra.mxu1 %vm74_vm0, %v1755_v5 }
0x110a   :  { %v2271_v2 = vpop.f32.mrf.mxu1 }
0x110b   :  { %v1838_v30 = vadd.f32 %v2271_v2, %v1672_v23 }
0x110c   :  { %v1828_v31 = vpop.f32.mrf.mxu1 }
0x110d   :  { %v1837_v32 = vadd.f32 %v1828_v31, %v1671_v20  ;;  %v1842_v33 = vsel %vm74_vm0, %v1838_v30, 0.0  ;;  %v1848_v34 = vmul.f32 %v1838_v30, %v1838_v30 }
0x110e   :  { %1843 = vadd.xlane.f32.xlu0 %v1842_v33 }
0x110f   :  { %v1839_v35 = vsel %vm74_vm0, %v1837_v32, 0.0  ;;  %v1847_v36 = vmul.f32 %v1837_v32, %v1837_v32  ;;  %v1852_v37 = vsel %vm74_vm0, %v1848_v34, 0.0 }
0x1110   :  { %1840 = vadd.xlane.f32.xlu1 %v1839_v35 }
0x1111   :  { %v1849_v40 = vsel %vm74_vm0, %v1847_v36, 0.0 }
0x1112   :  { %1853 = vadd.xlane.f32.xlu0 %v1852_v37 }
0x1114   :  { %1850 = vadd.xlane.f32.xlu1 %v1849_v40 }
0x1197   :  { %v1844_v45 = vpop.xlane.xlu0 %1843 }
0x1198   :  { %v1846_v46 = vmul.f32 0.03125, %v1844_v45 }
0x1199   :  { %v1841_v47 = vpop.xlane.xlu1 %1840 }
0x119a   :  { %v1845_v48 = vmul.f32 0.03125, %v1841_v47  ;;  %v1858_v50 = vmul.f32 %v1846_v46, %v1846_v46  ;;  %v1864_v60 = vsub.f32 %v1838_v30, %v1846_v46 }
0x119b   :  { %v1854_v49 = vpop.xlane.xlu0 %1853 }
0x119c   :  { %v1856_v51 = vmul.f32 0.03125, %v1854_v49  ;;  %v1857_v53 = vmul.f32 %v1845_v48, %v1845_v48  ;;  %v1863_v61 = vsub.f32 %v1837_v32, %v1845_v48 }
0x119d   :  { %v1851_v52 = vpop.xlane.xlu1 %1850 }
0x119e   :  { %v1860_v54 = vsub.f32 %v1856_v51, %v1858_v50  ;;  %v1855_v55 = vmul.f32 0.03125, %v1851_v52 }
0x11a0   :  { %v1862_v56 = vmax.f32 %v1860_v54, 0.0  ;;  %v1859_v57 = vsub.f32 %v1855_v55, %v1857_v53 }
0x11a2   :  { %v1866_v58 = vadd.f32 1e-05, %v1862_v56  ;;  %v1861_v59 = vmax.f32 %v1859_v57, 0.0 }
0x11a4   :  { %2338 = vrsqrt.f32 %v1866_v58  ;;  %v1865_v39 = vadd.f32 1e-05, %v1861_v59 }
0x11a6   :  { %2340 = vrsqrt.f32 %v1865_v39 }
0x11b1   :  { %v2339_v38 = vpop.eup %2338 }
0x11b2   :  { %v1870_v63 = vmul.f32 %v2339_v38, %v1864_v60 }
0x11b3   :  { %v2341_v62 = vpop.eup %2340 }
0x11b4   :  { %v1869_v1 = vmul.f32 %v2341_v62, %v1863_v61  ;;  %v1876_v4 = vmul.f32 %v2029_v0, %v1870_v63 }
0x11b6   :  { %v1875_v3 = vmul.f32 %v2029_v0, %v1869_v1 }
0x11b8   :  { %2280 = vmatprep.mubr.msk.f32.mxu0 %vm74_vm0, %v1875_v3 }
0x11b9   :  { %2281 = vmatmul.mubr.msk.f32.vlgmr.msra.gmra.mxu0 %vm74_vm0, %v1876_v4 }
0x1279   :  { %v2282_v7 = vpop.f32.mrf.mxu0 }
0x127a   :  { %1963 = vst [vmem:[#allocation8 + $0x8] sm:$0xff] %v2282_v7 }
0x127b   :  { %v1953_v13 = vpop.f32.mrf.mxu0 }
0x127c   :  { %1962 = vst [vmem:[#allocation8] sm:$0xff] %v1953_v13 }
0x127d   :  { %2413 = shalt.err (!%p2410_p5)
}
0x127e   :  { %1975 = dma.vmem_to_hbm [thread:$0]  %s1970_s5, 256, %s2648_s3, [#allocation4], %s2430_s17, %s2430_s17, %s2431_s18  }
0x127f   :  { %2426 = dma.done.wait [#allocation4], 256  }
0x1280   :  { %2427 = vsyncadd [#allocation4], 4294967040 }
0x1281   :  { %1979 = vsyncpa [#allocation3], 1 }
0x1282   :  { %1980 = vsyncpa [#allocation6], 1 }
0x1283   :  { %1981 = vsyncpa [#allocation4], 1 }

</bundles_post_ra>
